<compile_context>
chip_gen: v7x
topology: tpu7x:2x2x1
jax: 0.10.0
libtpu: 0.0.40
codegen_flags: <defaults>
</compile_context>

<pallas_src>
import functools

import jax
import jax.numpy as jnp
from jax.experimental import pallas as pl
from jax.experimental.pallas import tpu as pltpu

BN_EPS = 1e-5
LEAKY_SLOPE = 0.1


def _round_up(x, m):
    return (x + m - 1) // m * m


def _pick_tile_l(l_out_pad):
    for t in (2048, 1024, 512, 256, 128):
        if l_out_pad % t == 0:
            return t
    return 128


def _halo(ksize):
    # Extra lane-aligned columns loaded past the tile so static k-shifts stay in bounds.
    return _round_up(max(ksize - 1, 1), 128)


def _conv_tile(x_ref, w_ref, *, ksize, stride, tile_l):
    """One (Cout_pad, tile_l) conv output tile in f32.

    x_ref: (1, Cin, L_conv)  -- whole padded sample, resident in VMEM across the L grid axis
    w_ref: (K, Cout_pad, Cin)
    """
    lt = pl.program_id(1)
    cout_p = w_ref.shape[1]
    acc = jnp.zeros((cout_p, tile_l), jnp.float32)
    base = pl.multiple_of(lt * (tile_l * stride), 128)
    if stride == 1:
        # One aligned dynamic-start load, then K cheap static lane-shifted slices.
        slab = x_ref[0, :, pl.ds(base, tile_l + _halo(ksize))]
        for k in range(ksize):
            xs = slab[:, k:k + tile_l]
            acc = acc + jnp.dot(w_ref[k], xs, preferred_element_type=jnp.float32)
    else:
        # TODO(synk): generic strided path (unexercised by the demo, which uses stride=1).
        for k in range(ksize):
            xs = x_ref[0, :, pl.ds(base + k, tile_l, stride)]
            acc = acc + jnp.dot(w_ref[k], xs, preferred_element_type=jnp.float32)
    return acc


def _conv_stats_kernel(x_ref, w_ref, y_ref, s1_ref, s2_ref, *,
                       ksize, stride, tile_l, l_out, l_out_pad):
    """Pass 1: conv tile + per-channel sum / sum-of-squares accumulation over the L axis."""
    lt = pl.program_id(1)
    acc = _conv_tile(x_ref, w_ref, ksize=ksize, stride=stride, tile_l=tile_l)
    y_ref[0] = acc.astype(y_ref.dtype)           # unnormalized conv output (lane-dense on L)

    # Only positions t < l_out contribute to BatchNorm batch statistics.
    if l_out_pad != l_out:
        col = jax.lax.broadcasted_iota(jnp.int32, (1, tile_l), 1)
        acc_m = jnp.where(col < (l_out - lt * tile_l), acc, 0.0)
    else:
        acc_m = acc
    part1 = jnp.sum(acc_m, axis=1, keepdims=True)           # (Cout_pad, 1)
    part2 = jnp.sum(acc_m * acc_m, axis=1, keepdims=True)   # (Cout_pad, 1)

    @pl.when(lt == 0)
    def _():
        s1_ref[0] = part1
        s2_ref[0] = part2

    @pl.when(lt > 0)
    def _():
        s1_ref[0] = s1_ref[0] + part1
        s2_ref[0] = s2_ref[0] + part2


def _bn_leaky_kernel(y_ref, scale_ref, shift_ref, o_ref):
    """Pass 2: y * scale + shift, then LeakyReLU(0.1).  Pure VPU elementwise."""
    y = y_ref[0]
    y = y * scale_ref[...] + shift_ref[...]
    o_ref[0] = jnp.where(y > 0, y, LEAKY_SLOPE * y).astype(o_ref.dtype)


def _conv_bias_kernel(x_ref, w_ref, b_ref, o_ref, *, ksize, stride, tile_l):
    """batch_norm_activation=False branch: conv + bias."""
    acc = _conv_tile(x_ref, w_ref, ksize=ksize, stride=stride, tile_l=tile_l)
    o_ref[0] = (acc + b_ref[...]).astype(o_ref.dtype)


@functools.partial(
    jax.jit,
    static_argnames=("kernel_size", "stride", "padding", "use_bn_activation", "compute_dtype"))
def cnn1d_block(x, weight, bias, gamma, beta, *, kernel_size, stride, padding,
                use_bn_activation, compute_dtype=jnp.bfloat16):
    """Forward pass of CNN1DBlock.

    x:      (N, C_in, L)     float32
    weight: (C_out, C_in, K) float32 (nn.Conv1d layout)
    bias:   (C_out,)                 (only used when use_bn_activation=False)
    gamma/beta: (C_out,)             (BatchNorm1d affine params)
    returns (N, C_out, L_out) float32
    """
    n, c_in, length = x.shape
    c_out = weight.shape[0]
    k = kernel_size

    l_out = (length + 2 * padding - k) // stride + 1
    l_out_pad = _round_up(l_out, 128)
    tile_l = _pick_tile_l(l_out_pad)
    n_lt = l_out_pad // tile_l
    c_out_p = _round_up(c_out, 8)

    # Padded conv input: conv zero padding on the left/right plus enough zero tail that every
    # output tile (and its halo) reads in-bounds.  Extra columns are zero -> harmless.
    if stride == 1:
        l_conv = max(l_out_pad + _halo(k), length + 2 * padding)
    else:
        l_conv = max((l_out_pad - 1) * stride + k, length + 2 * padding)
    x_conv = jnp.pad(x, ((0, 0), (0, 0), (padding, l_conv - padding - length)))
    x_conv = x_conv.astype(compute_dtype)

    # Weights: (Cout, Cin, K) -> (K, Cout_pad, Cin); padded output channels are all-zero.
    w_t = jnp.transpose(weight, (2, 0, 1))
    w_t = jnp.pad(w_t, ((0, 0), (0, c_out_p - c_out), (0, 0))).astype(compute_dtype)

    grid = (n, n_lt)
    x_spec = pl.BlockSpec((1, c_in, l_conv), lambda i, j: (i, 0, 0))        # resident across L axis
    w_spec = pl.BlockSpec((k, c_out_p, c_in), lambda i, j: (0, 0, 0))       # loaded once
    y_spec = pl.BlockSpec((1, c_out_p, tile_l), lambda i, j: (i, 0, j))     # lane-dense output tile
    stat_spec = pl.BlockSpec((1, c_out_p, 1), lambda i, j: (i, 0, 0))       # per-sample partial sums
    chan_spec = pl.BlockSpec((c_out_p, 1), lambda i, j: (0, 0))             # per-channel params

    itemsize = jnp.dtype(compute_dtype).itemsize
    conv_flops = 2 * n * l_out_pad * c_out_p * c_in * k
    io_bytes = (n * c_in * l_conv * itemsize
                + k * c_out_p * c_in * itemsize
                + n * c_out_p * l_out_pad * 4)
    conv_cost = pl.CostEstimate(flops=conv_flops, transcendentals=0, bytes_accessed=io_bytes)

    if use_bn_activation:
        # Pass 1: conv + per-channel sum / sumsq accumulation.
        y, s1, s2 = pl.pallas_call(
            functools.partial(_conv_stats_kernel, ksize=k, stride=stride, tile_l=tile_l,
                              l_out=l_out, l_out_pad=l_out_pad),
            grid=grid,
            in_specs=[x_spec, w_spec],
            out_specs=(y_spec, stat_spec, stat_spec),
            out_shape=(jax.ShapeDtypeStruct((n, c_out_p, l_out_pad), jnp.float32),
                       jax.ShapeDtypeStruct((n, c_out_p, 1), jnp.float32),
                       jax.ShapeDtypeStruct((n, c_out_p, 1), jnp.float32)),
            compiler_params=pltpu.CompilerParams(
                dimension_semantics=("parallel", "arbitrary")),
            cost_estimate=conv_cost,
        )(x_conv, w_t)

        # Finalize global (over N and L_out) batch statistics -> per-channel scale/shift.
        m_total = float(n * l_out)
        sums = jnp.sum(s1[:, :c_out, 0], axis=0)
        sqsums = jnp.sum(s2[:, :c_out, 0], axis=0)
        mean = sums / m_total
        var = jnp.maximum(sqsums / m_total - mean * mean, 0.0)   # biased (training-mode) variance
        scale = gamma * jax.lax.rsqrt(var + BN_EPS)
        shift = beta - mean * scale
        scale_p = jnp.pad(scale, (0, c_out_p - c_out)).reshape(c_out_p, 1).astype(jnp.float32)
        shift_p = jnp.pad(shift, (0, c_out_p - c_out)).reshape(c_out_p, 1).astype(jnp.float32)

        # Pass 2: cheap elementwise normalize + LeakyReLU.
        out = pl.pallas_call(
            _bn_leaky_kernel,
            grid=grid,
            in_specs=[y_spec, chan_spec, chan_spec],
            out_specs=y_spec,
            out_shape=jax.ShapeDtypeStruct((n, c_out_p, l_out_pad), jnp.float32),
            compiler_params=pltpu.CompilerParams(
                dimension_semantics=("parallel", "parallel")),
        )(y, scale_p, shift_p)
    else:
        b_p = jnp.pad(bias, (0, c_out_p - c_out)).reshape(c_out_p, 1).astype(jnp.float32)
        out = pl.pallas_call(
            functools.partial(_conv_bias_kernel, ksize=k, stride=stride, tile_l=tile_l),
            grid=grid,
            in_specs=[x_spec, w_spec, chan_spec],
            out_specs=y_spec,
            out_shape=jax.ShapeDtypeStruct((n, c_out_p, l_out_pad), jnp.float32),
            compiler_params=pltpu.CompilerParams(
                dimension_semantics=("parallel", "parallel")),
            cost_estimate=conv_cost,
        )(x_conv, w_t, b_p)

    # Drop channel/length padding.  Output is already NCL -> no transpose.
    return out[:, :c_out, :l_out]


def _reference(x, weight, bias, gamma, beta, *, stride, padding, use_bn_activation):
    """Pure-JAX reference matching PyTorch semantics (training-mode BN)."""
    y = jax.lax.conv_general_dilated(
        x, weight, window_strides=(stride,), padding=[(padding, padding)],
        dimension_numbers=("NCH", "OIH", "NCH"))
    if not use_bn_activation:
        return y + bias[None, :, None]
    mean = jnp.mean(y, axis=(0, 2), keepdims=True)
    var = jnp.mean((y - mean) ** 2, axis=(0, 2), keepdims=True)
    y = (y - mean) * jax.lax.rsqrt(var + BN_EPS)
    y = y * gamma[None, :, None] + beta[None, :, None]
    return jnp.where(y > 0, y, LEAKY_SLOPE * y)


if __name__ == "__main__":
    # Small, module-consistent shapes: batch=2, in_channels=4, L=16,
    # out_channels=8, kernel_size=3, stride=1, padding=1.
    N, C_IN, L = 2, 4, 16
    C_OUT, K, STRIDE, PAD = 8, 3, 1, 1

    key = jax.random.PRNGKey(0)
    kx, kw, kb = jax.random.split(key, 3)
    x = jax.random.normal(kx, (N, C_IN, L), dtype=jnp.float32)

    fan_in = C_IN * K
    bound = 1.0 / (fan_in ** 0.5)
    weight = jax.random.uniform(kw, (C_OUT, C_IN, K), minval=-bound, maxval=bound, dtype=jnp.float32)
    bias = jax.random.uniform(kb, (C_OUT,), minval=-bound, maxval=bound, dtype=jnp.float32)
    gamma = jnp.ones((C_OUT,), dtype=jnp.float32)
    beta = jnp.zeros((C_OUT,), dtype=jnp.float32)

    ref_bn = _reference(x, weight, bias, gamma, beta,
                        stride=STRIDE, padding=PAD, use_bn_activation=True)
    ref_lin = _reference(x, weight, bias, gamma, beta,
                         stride=STRIDE, padding=PAD, use_bn_activation=False)

    # BN path, f32 MXU inputs: strict check.
    out_f32 = jax.block_until_ready(cnn1d_block(
        x, weight, bias, gamma, beta, kernel_size=K, stride=STRIDE, padding=PAD,
        use_bn_activation=True, compute_dtype=jnp.float32))
    assert out_f32.shape == (N, C_OUT, L)
    assert jnp.allclose(out_f32, ref_bn, atol=2e-4, rtol=2e-4), "mismatch vs reference (bn, f32)"

    # BN path, default bf16 MXU inputs (halves DMA bytes): loose sanity check vs f32 reference.
    out_bf16 = jax.block_until_ready(cnn1d_block(
        x, weight, bias, gamma, beta, kernel_size=K, stride=STRIDE, padding=PAD,
        use_bn_activation=True))
    assert out_bf16.shape == (N, C_OUT, L)
    assert jnp.allclose(out_bf16, ref_bn, atol=5e-2, rtol=5e-2), "mismatch vs reference (bn, bf16)"

    # Linear path (conv + bias), f32: strict check.
    out_lin = jax.block_until_ready(cnn1d_block(
        x, weight, bias, gamma, beta, kernel_size=K, stride=STRIDE, padding=PAD,
        use_bn_activation=False, compute_dtype=jnp.float32))
    assert jnp.allclose(out_lin, ref_lin, atol=2e-4, rtol=2e-4), "mismatch vs reference (linear)"

    print("KERNEL_OK")
</pallas_src>

<mosaic_0001>
module attributes {stable_mosaic.version = 11 : i64} {
  func.func @_conv_stats_kernel(%arg0: i32, %arg1: i32, %arg2: memref<1x4x256xf32, #tpu.memory_space<vmem>>, %arg3: memref<3x8x4xf32, #tpu.memory_space<vmem>>, %arg4: memref<1x8x128xf32, #tpu.memory_space<vmem>>, %arg5: memref<1x8x1xf32, #tpu.memory_space<vmem>>, %arg6: memref<1x8x1xf32, #tpu.memory_space<vmem>>) attributes {dimension_semantics = [#tpu.dimension_semantics<parallel>, #tpu.dimension_semantics<arbitrary>], iteration_bounds = array<i64: 2, 1>, scalar_prefetch = 0 : i64, scratch_operands = 0 : i64, tpu.core_type = #tpu.core_type<tc>, window_params = [{transform_indices = @transform_0, window_bounds = array<i64: 1, 4, 256>}, {pipeline_mode = #tpu.pipeline_mode<synchronous>, transform_indices = @transform_1, window_bounds = array<i64: 3, 8, 4>}, {transform_indices = @transform_2, window_bounds = array<i64: 1, 8, 128>}, {transform_indices = @transform_3, window_bounds = array<i64: 1, 8, 1>}, {transform_indices = @transform_4, window_bounds = array<i64: 1, 8, 1>}]} {
    %cst = arith.constant 0.000000e+00 : f32
    %0 = vector.broadcast %cst : f32 to vector<8x128xf32>
    %c128_i32 = arith.constant 128 : i32
    %1 = arith.muli %arg1, %c128_i32 : i32
    %2 = tpu.assume_multiple %1, 128 : i32
    %c0 = arith.constant 0 : index
    %c0_0 = arith.constant 0 : index
    %3 = arith.index_cast %2 : i32 to index
    %4 = vector.load %arg2[%c0, %c0_0, %3] : memref<1x4x256xf32, #tpu.memory_space<vmem>>, vector<1x4x256xf32>
    %5 = vector.shape_cast %4 : vector<1x4x256xf32> to vector<4x256xf32>
    %6 = vector.extract_strided_slice %5 {offsets = [0, 0], sizes = [4, 128], strides = [1, 1]} : vector<4x256xf32> to vector<4x128xf32>
    %c0_1 = arith.constant 0 : index
    %c0_2 = arith.constant 0 : index
    %c0_3 = arith.constant 0 : index
    %7 = vector.load %arg3[%c0_1, %c0_2, %c0_3] : memref<3x8x4xf32, #tpu.memory_space<vmem>>, vector<1x8x4xf32>
    %8 = vector.shape_cast %7 : vector<1x8x4xf32> to vector<8x4xf32>
    %cst_4 = arith.constant dense<0.000000e+00> : vector<8x128xf32>
    %9 = tpu.matmul %8, %6, %cst_4 {dimension_numbers = #tpu.dot_dimension_numbers<[1], [0], [0], [1], [0, 0, 1, 1], [], []>} : vector<8x4xf32>, vector<4x128xf32>, vector<8x128xf32> -> vector<8x128xf32>
    %10 = arith.addf %0, %9 : vector<8x128xf32>
    %11 = vector.extract_strided_slice %5 {offsets = [0, 1], sizes = [4, 128], strides = [1, 1]} : vector<4x256xf32> to vector<4x128xf32>
    %c1 = arith.constant 1 : index
    %c0_5 = arith.constant 0 : index
    %c0_6 = arith.constant 0 : index
    %12 = vector.load %arg3[%c1, %c0_5, %c0_6] : memref<3x8x4xf32, #tpu.memory_space<vmem>>, vector<1x8x4xf32>
    %13 = vector.shape_cast %12 : vector<1x8x4xf32> to vector<8x4xf32>
    %cst_7 = arith.constant dense<0.000000e+00> : vector<8x128xf32>
    %14 = tpu.matmul %13, %11, %cst_7 {dimension_numbers = #tpu.dot_dimension_numbers<[1], [0], [0], [1], [0, 0, 1, 1], [], []>} : vector<8x4xf32>, vector<4x128xf32>, vector<8x128xf32> -> vector<8x128xf32>
    %15 = arith.addf %10, %14 : vector<8x128xf32>
    %16 = vector.extract_strided_slice %5 {offsets = [0, 2], sizes = [4, 128], strides = [1, 1]} : vector<4x256xf32> to vector<4x128xf32>
    %c2 = arith.constant 2 : index
    %c0_8 = arith.constant 0 : index
    %c0_9 = arith.constant 0 : index
    %17 = vector.load %arg3[%c2, %c0_8, %c0_9] : memref<3x8x4xf32, #tpu.memory_space<vmem>>, vector<1x8x4xf32>
    %18 = vector.shape_cast %17 : vector<1x8x4xf32> to vector<8x4xf32>
    %cst_10 = arith.constant dense<0.000000e+00> : vector<8x128xf32>
    %19 = tpu.matmul %18, %16, %cst_10 {dimension_numbers = #tpu.dot_dimension_numbers<[1], [0], [0], [1], [0, 0, 1, 1], [], []>} : vector<8x4xf32>, vector<4x128xf32>, vector<8x128xf32> -> vector<8x128xf32>
    %20 = arith.addf %15, %19 : vector<8x128xf32>
    %c0_11 = arith.constant 0 : index
    %c0_12 = arith.constant 0 : index
    %c0_13 = arith.constant 0 : index
    %21 = vector.load %arg4[%c0_11, %c0_12, %c0_13] : memref<1x8x128xf32, #tpu.memory_space<vmem>>, vector<1x8x128xf32>
    %22 = vector.shape_cast %21 : vector<1x8x128xf32> to vector<8x128xf32>
    %23 = vector.shape_cast %20 : vector<8x128xf32> to vector<1x8x128xf32>
    tpu.vector_store %arg4[%c0_11, %c0_12, %c0_13], %23 {strides = array<i32>} : memref<1x8x128xf32, #tpu.memory_space<vmem>>, vector<1x8x128xf32>,
    %24 = tpu.iota {dimensions = array<i32: 1>} : vector<1x128xi32>
    %c128_i32_14 = arith.constant 128 : i32
    %25 = arith.muli %arg1, %c128_i32_14 : i32
    %c16_i32 = arith.constant 16 : i32
    %26 = arith.subi %c16_i32, %25 : i32
    %27 = vector.broadcast %26 : i32 to vector<1x128xi32>
    %28 = arith.cmpi slt, %24, %27 : vector<1x128xi32>
    %cst_15 = arith.constant 0.000000e+00 : f32
    %29 = vector.shape_cast %28 : vector<1x128xi1> to vector<1x128xi1>
    %30 = vector.broadcast %29 : vector<1x128xi1> to vector<8x128xi1>
    %31 = vector.broadcast %cst_15 : f32 to vector<8x128xf32>
    %32 = arith.select %30, %20, %31 : vector<8x128xi1>, vector<8x128xf32>
    %cst_16 = arith.constant dense<0.000000e+00> : vector<8xf32>
    %33 = vector.multi_reduction <add>, %32, %cst_16 [1] : vector<8x128xf32> to vector<8xf32>
    %34 = vector.shape_cast %33 : vector<8xf32> to vector<8x1xf32>
    %35 = arith.mulf %32, %32 : vector<8x128xf32>
    %cst_17 = arith.constant dense<0.000000e+00> : vector<8xf32>
    %36 = vector.multi_reduction <add>, %35, %cst_17 [1] : vector<8x128xf32> to vector<8xf32>
    %37 = vector.shape_cast %36 : vector<8xf32> to vector<8x1xf32>
    %c0_i32 = arith.constant 0 : i32
    %38 = arith.cmpi eq, %arg1, %c0_i32 : i32
    %39 = arith.extui %38 : i1 to i32
    %c0_i32_18 = arith.constant 0 : i32
    %40 = arith.cmpi ne, %39, %c0_i32_18 : i32
    scf.if %40 {
      %c0_21 = arith.constant 0 : index
      %c0_22 = arith.constant 0 : index
      %c0_23 = arith.constant 0 : index
      %44 = vector.load %arg5[%c0_21, %c0_22, %c0_23] : memref<1x8x1xf32, #tpu.memory_space<vmem>>, vector<1x8x1xf32>
      %45 = vector.shape_cast %44 : vector<1x8x1xf32> to vector<8x1xf32>
      %46 = vector.shape_cast %34 : vector<8x1xf32> to vector<1x8x1xf32>
      tpu.vector_store %arg5[%c0_21, %c0_22, %c0_23], %46 {strides = array<i32>} : memref<1x8x1xf32, #tpu.memory_space<vmem>>, vector<1x8x1xf32>,
      %c0_24 = arith.constant 0 : index
      %c0_25 = arith.constant 0 : index
      %c0_26 = arith.constant 0 : index
      %47 = vector.load %arg6[%c0_24, %c0_25, %c0_26] : memref<1x8x1xf32, #tpu.memory_space<vmem>>, vector<1x8x1xf32>
      %48 = vector.shape_cast %47 : vector<1x8x1xf32> to vector<8x1xf32>
      %49 = vector.shape_cast %37 : vector<8x1xf32> to vector<1x8x1xf32>
      tpu.vector_store %arg6[%c0_24, %c0_25, %c0_26], %49 {strides = array<i32>} : memref<1x8x1xf32, #tpu.memory_space<vmem>>, vector<1x8x1xf32>,
    } else {
    }
    %c0_i32_19 = arith.constant 0 : i32
    %41 = arith.cmpi sgt, %arg1, %c0_i32_19 : i32
    %42 = arith.extui %41 : i1 to i32
    %c0_i32_20 = arith.constant 0 : i32
    %43 = arith.cmpi ne, %42, %c0_i32_20 : i32
    scf.if %43 {
      %c0_21 = arith.constant 0 : index
      %c0_22 = arith.constant 0 : index
      %c0_23 = arith.constant 0 : index
      %44 = vector.load %arg5[%c0_21, %c0_22, %c0_23] : memref<1x8x1xf32, #tpu.memory_space<vmem>>, vector<1x8x1xf32>
      %45 = vector.shape_cast %44 : vector<1x8x1xf32> to vector<8x1xf32>
      %46 = arith.addf %45, %34 : vector<8x1xf32>
      %c0_24 = arith.constant 0 : index
      %c0_25 = arith.constant 0 : index
      %c0_26 = arith.constant 0 : index
      %47 = vector.load %arg5[%c0_24, %c0_25, %c0_26] : memref<1x8x1xf32, #tpu.memory_space<vmem>>, vector<1x8x1xf32>
      %48 = vector.shape_cast %47 : vector<1x8x1xf32> to vector<8x1xf32>
      %49 = vector.shape_cast %46 : vector<8x1xf32> to vector<1x8x1xf32>
      tpu.vector_store %arg5[%c0_24, %c0_25, %c0_26], %49 {strides = array<i32>} : memref<1x8x1xf32, #tpu.memory_space<vmem>>, vector<1x8x1xf32>,
      %c0_27 = arith.constant 0 : index
      %c0_28 = arith.constant 0 : index
      %c0_29 = arith.constant 0 : index
      %50 = vector.load %arg6[%c0_27, %c0_28, %c0_29] : memref<1x8x1xf32, #tpu.memory_space<vmem>>, vector<1x8x1xf32>
      %51 = vector.shape_cast %50 : vector<1x8x1xf32> to vector<8x1xf32>
      %52 = arith.addf %51, %37 : vector<8x1xf32>
      %c0_30 = arith.constant 0 : index
      %c0_31 = arith.constant 0 : index
      %c0_32 = arith.constant 0 : index
      %53 = vector.load %arg6[%c0_30, %c0_31, %c0_32] : memref<1x8x1xf32, #tpu.memory_space<vmem>>, vector<1x8x1xf32>
      %54 = vector.shape_cast %53 : vector<1x8x1xf32> to vector<8x1xf32>
      %55 = vector.shape_cast %52 : vector<8x1xf32> to vector<1x8x1xf32>
      tpu.vector_store %arg6[%c0_30, %c0_31, %c0_32], %55 {strides = array<i32>} : memref<1x8x1xf32, #tpu.memory_space<vmem>>, vector<1x8x1xf32>,
    } else {
    }
    return
  }
  func.func @transform_0(%arg0: i32, %arg1: i32) -> (i32, i32, i32) {
    %c0_i32 = arith.constant 0 : i32
    %c0_i32_0 = arith.constant 0 : i32
    %c0_i32_1 = arith.constant 0 : i32
    return %arg0, %c0_i32, %c0_i32_0 : i32, i32, i32
  }
  func.func @transform_1(%arg0: i32, %arg1: i32) -> (i32, i32, i32) {
    %c0_i32 = arith.constant 0 : i32
    %c0_i32_0 = arith.constant 0 : i32
    %c0_i32_1 = arith.constant 0 : i32
    %c0_i32_2 = arith.constant 0 : i32
    return %c0_i32, %c0_i32_0, %c0_i32_1 : i32, i32, i32
  }
  func.func @transform_2(%arg0: i32, %arg1: i32) -> (i32, i32, i32) {
    %c0_i32 = arith.constant 0 : i32
    %c0_i32_0 = arith.constant 0 : i32
    return %arg0, %c0_i32, %arg1 : i32, i32, i32
  }
  func.func @transform_3(%arg0: i32, %arg1: i32) -> (i32, i32, i32) {
    %c0_i32 = arith.constant 0 : i32
    %c0_i32_0 = arith.constant 0 : i32
    %c0_i32_1 = arith.constant 0 : i32
    return %arg0, %c0_i32, %c0_i32_0 : i32, i32, i32
  }
  func.func @transform_4(%arg0: i32, %arg1: i32) -> (i32, i32, i32) {
    %c0_i32 = arith.constant 0 : i32
    %c0_i32_0 = arith.constant 0 : i32
    %c0_i32_1 = arith.constant 0 : i32
    return %arg0, %c0_i32, %c0_i32_0 : i32, i32, i32
  }
}

module attributes {stable_mosaic.version = 11 : i64} {
  func.func @_bn_leaky_kernel(%arg0: i32, %arg1: i32, %arg2: memref<1x8x128xf32, #tpu.memory_space<vmem>>, %arg3: memref<8x1xf32, #tpu.memory_space<vmem>>, %arg4: memref<8x1xf32, #tpu.memory_space<vmem>>, %arg5: memref<1x8x128xf32, #tpu.memory_space<vmem>>) attributes {dimension_semantics = [#tpu.dimension_semantics<parallel>, #tpu.dimension_semantics<parallel>], iteration_bounds = array<i64: 2, 1>, scalar_prefetch = 0 : i64, scratch_operands = 0 : i64, tpu.core_type = #tpu.core_type<tc>, window_params = [{transform_indices = @transform_0, window_bounds = array<i64: 1, 8, 128>}, {pipeline_mode = #tpu.pipeline_mode<synchronous>, transform_indices = @transform_1, window_bounds = array<i64: 8, 1>}, {pipeline_mode = #tpu.pipeline_mode<synchronous>, transform_indices = @transform_2, window_bounds = array<i64: 8, 1>}, {transform_indices = @transform_3, window_bounds = array<i64: 1, 8, 128>}]} {
    %c0 = arith.constant 0 : index
    %c0_0 = arith.constant 0 : index
    %c0_1 = arith.constant 0 : index
    %0 = vector.load %arg2[%c0, %c0_0, %c0_1] : memref<1x8x128xf32, #tpu.memory_space<vmem>>, vector<1x8x128xf32>
    %1 = vector.shape_cast %0 : vector<1x8x128xf32> to vector<8x128xf32>
    %c0_2 = arith.constant 0 : index
    %c0_3 = arith.constant 0 : index
    %2 = vector.load %arg3[%c0_2, %c0_3] : memref<8x1xf32, #tpu.memory_space<vmem>>, vector<8x1xf32>
    %3 = vector.broadcast %2 : vector<8x1xf32> to vector<8x128xf32>
    %4 = arith.mulf %1, %3 : vector<8x128xf32>
    %c0_4 = arith.constant 0 : index
    %c0_5 = arith.constant 0 : index
    %5 = vector.load %arg4[%c0_4, %c0_5] : memref<8x1xf32, #tpu.memory_space<vmem>>, vector<8x1xf32>
    %6 = vector.broadcast %5 : vector<8x1xf32> to vector<8x128xf32>
    %7 = arith.addf %4, %6 : vector<8x128xf32>
    %cst = arith.constant 0.000000e+00 : f32
    %8 = vector.broadcast %cst : f32 to vector<8x128xf32>
    %9 = arith.cmpf ogt, %7, %8 : vector<8x128xf32>
    %cst_6 = arith.constant 1.000000e-01 : f32
    %10 = vector.broadcast %cst_6 : f32 to vector<8x128xf32>
    %11 = arith.mulf %10, %7 : vector<8x128xf32>
    %12 = arith.select %9, %7, %11 : vector<8x128xi1>, vector<8x128xf32>
    %c0_7 = arith.constant 0 : index
    %c0_8 = arith.constant 0 : index
    %c0_9 = arith.constant 0 : index
    %13 = vector.load %arg5[%c0_7, %c0_8, %c0_9] : memref<1x8x128xf32, #tpu.memory_space<vmem>>, vector<1x8x128xf32>
    %14 = vector.shape_cast %13 : vector<1x8x128xf32> to vector<8x128xf32>
    %15 = vector.shape_cast %12 : vector<8x128xf32> to vector<1x8x128xf32>
    tpu.vector_store %arg5[%c0_7, %c0_8, %c0_9], %15 {strides = array<i32>} : memref<1x8x128xf32, #tpu.memory_space<vmem>>, vector<1x8x128xf32>,
    return
  }
  func.func @transform_0(%arg0: i32, %arg1: i32) -> (i32, i32, i32) {
    %c0_i32 = arith.constant 0 : i32
    %c0_i32_0 = arith.constant 0 : i32
    return %arg0, %c0_i32, %arg1 : i32, i32, i32
  }
  func.func @transform_1(%arg0: i32, %arg1: i32) -> (i32, i32) {
    %c0_i32 = arith.constant 0 : i32
    %c0_i32_0 = arith.constant 0 : i32
    %c0_i32_1 = arith.constant 0 : i32
    return %c0_i32, %c0_i32_0 : i32, i32
  }
  func.func @transform_2(%arg0: i32, %arg1: i32) -> (i32, i32) {
    %c0_i32 = arith.constant 0 : i32
    %c0_i32_0 = arith.constant 0 : i32
    %c0_i32_1 = arith.constant 0 : i32
    return %c0_i32, %c0_i32_0 : i32, i32
  }
  func.func @transform_3(%arg0: i32, %arg1: i32) -> (i32, i32, i32) {
    %c0_i32 = arith.constant 0 : i32
    %c0_i32_0 = arith.constant 0 : i32
    return %arg0, %c0_i32, %arg1 : i32, i32, i32
  }
}

</mosaic_0001>

<bundles_post_ra>
// kernel: cnn1d_block.3
= control target key start
LH: loop header
LB: loop body
LE: loop exit
PB: predicated region body
PF: predicated region fallthrough
CT: control target
= control target key end

     0   :  { %8 = vsyncpa [#allocation3], 0  ;;  %s584_s0 = inlined_call_operand.vmem [shape: f32[2,8,128], index: 0, kind: input, shape index: {}]   ;;  %s585_s1 = inlined_call_operand.vmem [shape: f32[8,1], index: 1, kind: input, shape index: {}]   ;;  %s586_s2 = inlined_call_operand.vmem [shape: f32[8,1], index: 2, kind: input, shape index: {}]   ;;  %s587_s3 = inlined_call_operand.hbm [shape: f32[2,8,128], index: 3, kind: output, shape index: {}]  }
   0x1   :  { %10 = vsyncpa [#allocation3 + $0x1], 0  ;;  %s466_s12 = smov 0   ;;  %s468_s13 = smov 0  }
   0x2   :  { %s470_s14 = smov 0   ;;  %s472_s15 = smov 0  }
   0x3   :  { %s474_s16 = smov 0   ;;  %s476_s17 = smov 0  }
   0x4 LB: > { %s296_s18 = sadd.s32 4294967295, %s442_s17   ;;  %s297_s19 = sadd.s32 4294967294, %s442_s17   ;;  %s442_s17 = sphi %s476_s17, %s16_s17   ;;  %s438_s16 = sphi %s474_s16, %s594_s16   ;;  %s434_s15 = sphi %s472_s15, %s593_s15   ;;  %s430_s14 = sphi %s470_s14, %s592_s14   ;;  %s426_s13 = sphi %s468_s13, %s591_s13   ;;  %s422_s12 = sphi %s466_s12, %s590_s12  }
   0x5   : > { %s28_s20 = sadd.s32 1, %s438_s16  ;;  %s107_s21 = sadd.s32 1, %s430_s14 }
   0x6   : > { %p30_p0 = scmp.ge.s32.totalorder %s28_s20, 2  ;;  %p117_p1 = scmp.ne.s32.totalorder %s430_s14, %s426_s13 }
   0x7   : > { %p118_p2 = scmp.eq.s32.totalorder %s296_s18, 1  ;;  %p123_p3 = scmp.ne.s32.totalorder %s426_s13, %s422_s12 }
   0x8   : > { %s596_s20 = smov (%p30_p0, %s28_s20), 0  ;;  %p124_p5 = scmp.eq.s32.totalorder %s297_s19, 1 }
   0x9   : > { %p506_p4 = por %p118_p2, %p117_p1  ;;  %s102_s23 = ssub.s32 %s438_s16, %s596_s20 }
   0xa   : > { %p300_p6 = scmp.ge.s32.totalorder %s442_s17, 1  ;;  %p105_p7 = scmp.eq.s32.totalorder %s102_s23, 0 }
   0xb   : > { %p513_p8 = por %p124_p5, %p123_p3  ;;  %p158_p9 = scmp.lt.s32.totalorder %s442_s17, 3 }
   0xc   : > { %s519_s25 = scalar_select %p105_p7, %s430_s14, %s107_s21  }
   0xd   : > { %p159_p10 = pnand %p300_p6, %p158_p9 }
   0xe   : > { %v192_v0 = vld [vmem:[%s585_s1] sm:$0xff] (!%p159_p10)  ;;  %v444_v1 = vmov (!%p159_p10), 0   ;;  %p184_p11 = scmp.lt.s32.totalorder (!%p159_p10), %s434_s15, 1  ;;  %s181_s5 = sand.u32 (!%p159_p10), 1, %s426_s13  }
   0xf   : > { %162 = sbr.rel (%p159_p10) target bundleno = 167 (0xa7), region = 32  ;;  %363 = vset.pattern.permute.xlu0 (!%p159_p10), %v444_v1  ;;  %v199_v2 = vld [vmem:[%s586_s2] sm:$0xff] (!%p159_p10)  ;;  %s301_s9 = sshll.u32 (!%p159_p10), %s181_s5, 3 }
  0x10   : > { %195 = vperm.xlu0 (!%p159_p10), %363, %v192_v0   ;;  %s304_s10 = sshll.u32 (!%p159_p10), %s434_s15, 7  ;;  %s183_s11 = scalar_lea.vmem (!%p159_p10), [#allocation2], %s301_s9 }
  0x11   : > { %s225_s18 = sshll.u32 (!%p159_p10), %s183_s11, 4  ;;  %s537_s23 = scalar_lea.hbm (!%p159_p10), %s587_s3, %s304_s10  ;;  %s539_s18 = int_to_ptr.vmem [resolvable:$true] %s225_s18 }
  0x12   : > { %s211_s26 = scalar_lea.sflag (!%p159_p10), [#allocation3], %s181_s5  ;;  %s364_s27 = scalar_lea.vmem (!%p159_p10), %s539_s18, 128 }
  0x13   : > { %p365_p12 = scmp.ne.s32.totalorder (!%p159_p10), %s539_s18, %s364_s27 }
  0x14   : > { %202 = vperm.xlu0 (!%p159_p10), %363, %v199_v2  }
  0x15   : > { %p366_p13 = pnand (!%p159_p10), %p365_p12, %p506_p4 }
  0x16   : > { %s185_s30 = scalar_select %p184_p11, %s434_s15, 1 }
  0x17   : > { %p367_p0 = pneg %p366_p13  ;;  %s445_s15 = smov [#allocation2]  }
  0x18   : > { %s302_s4 = sshll.u32 %s185_s30, 3  ;;  %s368_s28 = sshll.u32 %s445_s15, 4  ;;  %s369_s28 = int_to_ptr.vmem [resolvable:$false] %s368_s28 }
  0x19   : > { %s190_s8 = scalar_lea.vmem %s584_s0, %s302_s4  ;;  %s370_s29 = scalar_lea.vmem %s369_s28, 256 }
  0x1a   : > { %v191_v4 = vld [vmem:[%s190_s8] sm:$0xff]  ;;  %p371_p1 = scmp.lt.s32.totalorder %s539_s18, %s369_s28  ;;  %p372_p2 = scmp.lt.s32.totalorder %s370_s29, %s364_s27 }
  0x1c   : > { %p373_p3 = por %p372_p2, %p371_p1 }
  0x1e   : > { %p374_p5 = pnand %p373_p3, %p367_p0 }
  0x8f   : > { %v196_v3 = vpop.permute.xlu0 %195 }
  0x90   : > { %v198_v5 = vmul.f32 %v196_v3, %v191_v4 }
  0x93   : > { %v203_v6 = vpop.permute.xlu0 %202 }
  0x94   : > { %v205_v7 = vadd.f32 %v203_v6, %v198_v5 }
  0x96   : > { %vm206_vm0 = vcmp.gt.f32.partialorder %v205_v7, 0.0  ;;  %v207_v8 = vmul.f32 0.1, %v205_v7 }
  0x98   : > { %v208_v9 = vsel %vm206_vm0, %v205_v7, %v207_v8 }
  0x99   : > { %209 = vst [vmem:[%s183_s11] sm:$0xff] %v208_v9 }
  0x9a   : > { %377 = shalt.err (!%p374_p5)
}
  0x9b   : > { %s378_s30 = scalar_lea.hbm %s537_s23, 128  ;;  %s382_s6 = scalar_lea.hbm %s587_s3, 256 }
  0x9c   : > { %p379_p6 = scmp.ne.s32.totalorder %s537_s23, %s378_s30  ;;  %p383_p10 = scmp.lt.u32.totalorder %s537_s23, %s587_s3 }
  0x9d   : > { %p384_p11 = scmp.lt.u32.totalorder %s382_s6, %s378_s30  ;;  %p386_p13 = scmp.lt.u32.totalorder %s378_s30, %s537_s23 }
  0x9e   : > { %p380_p7 = pnand %p379_p6, %p506_p4 }
  0x9f   : > { %p385_p12 = por %p384_p11, %p383_p10 }
  0xa0   : > { %p381_p9 = pneg %p380_p7 }
  0xa1   : > { %p387_p0 = por %p386_p13, %p385_p12 }
  0xa3   : > { %p388_p1 = pnand %p387_p0, %p381_p9 }
  0xa5   : > { %391 = shalt.err (!%p388_p1)
}
  0xa6   : > { %307 = dma.vmem_to_hbm [thread:$0]  (%p506_p4), %s539_s18, 128, %s537_s23, %s211_s26  }
  0xa7 PF: > { %p313_p2 = scmp.ge.s32.totalorder %s442_s17, 2  ;;  %s237_s9 = sand.u32 1, %s422_s12  }
  0xa8   : > { %s238_s10 = scalar_lea.sflag [#allocation3], %s237_s9 }
  0xa9   : > { %p310_p3 = pnand %p313_p2, %p513_p8 }
  0xab   : > { %417 = dma.done.wait (!%p310_p3), %s238_s10, 128  }
  0xac   : > { %419 = vsyncadd (!%p310_p3), %s238_s10, 4294967168  ;;  %s16_s17 = sadd.s32 1, %s442_s17   ;;  %s590_s12 = smov %s426_s13 }
  0xad   : > { %p13_p5 = scmp.ge.s32.totalorder %s16_s17, 4   ;;  %s591_s13 = smov %s430_s14 }
  0xae   : > { %s592_s14 = smov %s519_s25  ;;  %s593_s15 = smov %s438_s16 }
  0xaf   : > { %s594_s16 = smov %s596_s20  ;;  %15 = sbr.rel (!%p13_p5) target bundleno = 4 (0x4), region = 67 }
  0xb6   :  { %243 = vsyncpa [#allocation3], 1 }
  0xb7   :  { %245 = vsyncpa [#allocation3 + $0x1], 1 }

// kernel: cnn1d_block.2
= control target key start
LH: loop header
LB: loop body
LE: loop exit
PB: predicated region body
PF: predicated region fallthrough
CT: control target
= control target key end

     0   :  { %s784_s15 = smov 0   ;;  %s786_s16 = smov 0   ;;  %s847_s0 = inlined_call_operand.vmem [shape: f32[2,4,256], index: 0, kind: input, shape index: {}]   ;;  %s848_s1 = inlined_call_operand.vmem [shape: f32[3,8,4], index: 1, kind: input, shape index: {}]   ;;  %s849_s2 = inlined_call_operand.vmem [shape: f32[2,8,128], index: 2, kind: output, shape index: {0}]   ;;  %s850_s3 = inlined_call_operand.vmem [shape: f32[2,8,1], index: 3, kind: output, shape index: {1}]   ;;  %s851_s4 = inlined_call_operand.vmem [shape: f32[2,8,1], index: 4, kind: output, shape index: {2}]  }
   0x1   :  { %s788_s17 = smov 0  }
   0x2 LB: > { %s27_s18 = sadd.s32 1, %s749_s16  ;;  %p661_p0 = scmp.ge.s32.totalorder %s753_s17, 1  ;;  %s753_s17 = sphi %s788_s17, %s15_s17   ;;  %s749_s16 = sphi %s786_s16, %s853_s16   ;;  %s745_s15 = sphi %s784_s15, %s852_s15  }
   0x3   : > { %p29_p1 = scmp.ge.s32.totalorder %s27_s18, 2  ;;  %p181_p2 = scmp.lt.s32.totalorder %s753_s17, 3 }
   0x5   : > { %s855_s18 = smov (%p29_p1, %s27_s18), 0  ;;  %p182_p3 = pnand %p661_p0, %p181_p2 }
   0x6   : > { %p217_p4 = scmp.lt.s32.totalorder (!%p182_p3), %s745_s15, 1  ;;  %v755_v0 = vmov (!%p182_p3), 0.0   ;;  %vm756_vm0 = vmmov (!%p182_p3), 0   ;;  %vm258_vm1 = vcmask (!%p182_p3), 1043456   ;;  %v243_v2 = vld [vmem:[%s848_s1] sm:$0xff] (!%p182_p3)  ;;  %vm254_vm2 = vcmask (!%p182_p3), 31744  }
   0x7   : > { %185 = sbr.rel (%p182_p3) target bundleno = 499 (0x1f3), region = 28  ;;  %689 = vmatprep.subr.mxu0 (!%p182_p3), %v755_v0  ;;  %691 = vmatprep.mubr.msk.f32.mxu0 (!%p182_p3), %vm756_vm0, %v755_v0  ;;  %s757_s25 = smov (!%p182_p3), 126   ;;  %vm412_vm3 = vcmask (!%p182_p3), 1031168   ;;  %vm252_vm4 = vcmask (!%p182_p3), 1039360   ;;  %v667_v8 = vld [vmem:[%s848_s1 + $0x8] sm:$0xff] (!%p182_p3)  ;;  %v672_v9 = vld [vmem:[%s848_s1 + $0x10] sm:$0xff] (!%p182_p3)  ;;  %v491_v12 = vlaneseq (!%p182_p3) }
   0x8   : > { %684 = vmatprep.subr.mxu1 (!%p182_p3), %v755_v0  ;;  %686 = vmatprep.mubr.msk.f32.mxu1 (!%p182_p3), %vm756_vm0, %v755_v0  ;;  %s758_s26 = smov (!%p182_p3), 127   ;;  %vm508_vm6 = vcmask (!%p182_p3), 7168  }
   0x9   : > { %v492_v13 = vand.u32 (!%p182_p3), 127, %v491_v12 }
   0xb   : > { %vm495_vm5 = vcmp.lt.s32.totalorder (!%p182_p3), %v492_v13, 16 }
   0xe   : > { %s857_s15 = smov (!%p217_p4, %s745_s15), 1 }
   0xf   : > { %s804_s19 = sshll.u32 %s857_s15, 3 }
  0x10   : > { %s221_s22 = scalar_lea.vmem %s847_s0, %s804_s19  ;;  %s228_s7 = scalar_lea.vmem %s849_s2, %s804_s19 }
  0x11   : > { %v242_v1 = vld [vmem:[%s221_s22] sm:$0xff]  ;;  %s232_s10 = scalar_lea.vmem %s850_s3, %s804_s19  ;;  %s236_s13 = scalar_lea.vmem %s851_s4, %s804_s19 }
  0x12   : > { %408 = vrot.lane.b32.xlu1 %v242_v1, %s757_s25  ;;  %248 = vrot.lane.b32.xlu0 %v242_v1, %s758_s26  ;;  %v247_v3 = vcombine.high %v242_v1, %v242_v1 }
  0x13   : > { %690 = vmatpush3.msk.msra.mxu0 %vm258_vm1, %v242_v1 }
  0x14   : > { %692 = vmatmul.mubr.msk.f32.vlgmr.msra.gmra.mrb[0].mxu0 %vm254_vm2, %v243_v2  ;;  %694 = vmatprep.subr.mxu0 %v755_v0 }
  0x15   : > { %696 = vmatprep.mubr.msk.f32.mxu0 %vm756_vm0, %v755_v0 }
  0x16   : > { %410 = vrot.lane.b32.xlu1 %v247_v3, %s757_s25  ;;  %250 = vrot.lane.b32.xlu0 %v247_v3, %s758_s26 }
  0x84   : > { %v409_v4 = vpop.permute.xlu1 %408  ;;  %v249_v5 = vpop.permute.xlu0 %248 }
  0x88   : > { %v411_v6 = vpop.permute.xlu1 %410  ;;  %v251_v7 = vpop.permute.xlu0 %250 }
  0x89   : > { %v413_v10 = vsel %vm412_vm3, %v409_v4, %v411_v6  ;;  %v253_v11 = vsel %vm252_vm4, %v249_v5, %v251_v7 }
  0x8a   : > { %685 = vmatpush3.msk.msra.mxu1 %vm258_vm1, %v253_v11  ;;  %695 = vmatpush3.msk.msra.mxu0 %vm258_vm1, %v413_v10 }
  0x8b   : > { %687 = vmatmul.mubr.msk.f32.vlgmr.msra.gmra.mrb[0].mxu1 %vm254_vm2, %v667_v8  ;;  %697 = vmatmul.mubr.msk.f32.vlgmr.msra.gmra.mrb[0].mxu0 %vm254_vm2, %v672_v9 }
 0x15e   : > { %v327_v14 = vpop.f32.mrb[0].mxu1  ;;  %v485_v15 = vpop.f32.mrb[0].mxu0 }
 0x15f   : > { %v699_v16 = vadd.f32 %v485_v15, %v327_v14  ;;  %v698_v17 = vpop.f32.mrb[1].mxu0  ;;  %v688_v18 = vpop.f32.mrb[1].mxu1 }
 0x161   : > { %490 = vst [vmem:[%s228_s7] sm:$0xff] %v699_v16  ;;  %v498_v19 = vsel %vm495_vm5, %v699_v16, 0.0 }
 0x162   : > { %499 = vadd.xlane.f32.xlu0 %v498_v19  ;;  %v501_v20 = vmul.f32 %v498_v19, %v498_v19 }
 0x164   : > { %502 = vadd.xlane.f32.xlu1 %v501_v20 }
 0x1ef   : > { %v500_v21 = vpop.xlane.xlu0 %499 }
 0x1f0   : > { %509 = vst.msk [vmem:[%s232_s10] sm:$0xff] %vm508_vm6, %v500_v21 }
 0x1f1   : > { %v503_v22 = vpop.xlane.xlu1 %502 }
 0x1f2   : > { %510 = vst.msk [vmem:[%s236_s13] sm:$0xff] %vm508_vm6, %v503_v22 }
 0x1f3 PF: > { %s15_s17 = sadd.s32 1, %s753_s17   ;;  %s852_s15 = smov %s749_s16 }
 0x1f4   : > { %p12_p5 = scmp.ge.s32.totalorder %s15_s17, 4   ;;  %s853_s16 = smov %s855_s18 }
 0x1f6   :  { %14 = sbr.rel (!%p12_p5) target bundleno = 2 (0x2), region = 93 }

</bundles_post_ra>
